<compile_context>
chip_gen: v7x
topology: tpu7x:2x2x1
jax: 0.10.0
libtpu: 0.0.40
codegen_flags: <defaults>
</compile_context>

<pallas_src>
import functools

import jax
import jax.numpy as jnp
import numpy as np
from jax.experimental import pallas as pl
from jax.experimental.pallas import tpu as pltpu


_LANE = 128  # vreg lane width (last dim)


def _round_up(x, m):
    return ((x + m - 1) // m) * m


# ----------------------------- Pallas kernel --------------------------------
def _fused_mlp_kernel(x_ref, w_ref, b_ref, o_ref, h_ref, *, num_layers, d_out):
    """One grid step == one Linear + ReLU layer.

    x_ref: (B, D_pad)      f32  lane-padded input activations (read at l==0)
    w_ref: (D_pad, D_pad)  bf16 layer-l weight (leading layer dim squeezed)
    b_ref: (1, D_pad)      f32  layer-l bias   (leading layer dim squeezed)
    o_ref: (B, D_out)      f32  unpadded output (written at l==num_layers-1)
    h_ref: (B, D_pad)      f32  VMEM scratch carrying activations across layers
    """
    l = pl.program_id(0)

    @pl.when(l == 0)
    def _():
        h_ref[...] = x_ref[...]

    # MXU matmul: bf16 x bf16 -> f32 accumulate.  Padded lanes of h are 0 and
    # padded rows/cols of W and b are 0, so padding stays exactly 0.
    y = jnp.dot(h_ref[...].astype(jnp.bfloat16), w_ref[...],
                preferred_element_type=jnp.float32)
    h_ref[...] = jnp.maximum(y + b_ref[...], 0.0)   # ReLU after every layer

    @pl.when(l == num_layers - 1)
    def _():
        o_ref[...] = h_ref[:, :d_out].astype(o_ref.dtype)


# ----------------------------- parameter handling ----------------------------
def init_mlp_params(key, d_in, hidden_shapes):
    """Mirror basic_init:
       - weight ~ U(-b, b), b = sqrt(1 / fan_in) with fan_in = weight.size(0)
         = out_features (quirk of _fanin_init on the (out, in) torch weight).
       - bias = 0.1.
    Returns [(W (d_in, d_out) f32, b (d_out,) f32), ...] in kernel layout
    (W pre-transposed so the kernel computes y = x @ W + b)."""
    params = []
    cur = int(d_in)
    for d_next in hidden_shapes:
        key, wk = jax.random.split(key)
        bound = float(np.sqrt(1.0 / d_next))
        w_torch = jax.random.uniform(
            wk, (d_next, cur), minval=-bound, maxval=bound, dtype=jnp.float32)
        params.append((w_torch.T, jnp.full((d_next,), 0.1, dtype=jnp.float32)))
        cur = d_next
    return params


def pack_mlp_params(params, d_in):
    """Zero-pad every layer to a common lane-dense D_pad and stack:
       weights -> (L, D_pad, D_pad) bf16, biases -> (L, 1, D_pad) f32."""
    dims = [int(d_in)] + [int(w.shape[1]) for (w, _) in params]
    d_pad = max(_round_up(d, _LANE) for d in dims)
    num_layers = len(params)

    w_stack = jnp.zeros((num_layers, d_pad, d_pad), jnp.bfloat16)
    b_stack = jnp.zeros((num_layers, 1, d_pad), jnp.float32)
    for l, (w, b) in enumerate(params):
        di, do = w.shape
        w_stack = w_stack.at[l, :di, :do].set(w.astype(jnp.bfloat16))
        b_stack = b_stack.at[l, 0, :do].set(b.astype(jnp.float32))
    return {"w": w_stack, "b": b_stack, "dims": dims, "d_pad": d_pad}


# ----------------------------- forward pass ----------------------------------
def mlp_base_forward(packed, x):
    """MLPBase.forward: flatten trailing dims, then the fused Linear+ReLU
    stack as ONE pallas_call pipelined over layers."""
    w_stack, b_stack = packed["w"], packed["b"]
    dims, d_pad = packed["dims"], packed["d_pad"]
    num_layers = int(w_stack.shape[0])
    d_in, d_out = dims[0], dims[-1]

    batch = x.shape[0]
    h = x.reshape(batch, -1).astype(jnp.float32)   # np.prod(input_shape)
    assert h.shape[1] == d_in
    # Single cheap lane-pad of the tiny activations (weights carry the rest
    # of the padding); no batch padding, no output slice round-trip.
    x_pad = jnp.pad(h, ((0, 0), (0, d_pad - d_in)))

    flops = 2 * batch * sum(dims[i] * dims[i + 1] for i in range(num_layers))
    bytes_accessed = (
        w_stack.size * w_stack.dtype.itemsize
        + b_stack.size * b_stack.dtype.itemsize
        + x_pad.size * 4 + batch * d_out * 4)

    kernel = functools.partial(
        _fused_mlp_kernel, num_layers=num_layers, d_out=d_out)

    return pl.pallas_call(
        kernel,
        out_shape=jax.ShapeDtypeStruct((batch, d_out), jnp.float32),
        grid=(num_layers,),
        in_specs=[
            # input activations: resident across all layer steps
            pl.BlockSpec((batch, d_pad), lambda l: (0, 0)),
            # layer-l weight tile: auto double-buffered -> layer l+1 weights
            # are prefetched while layer l runs on the MXU
            pl.BlockSpec((None, d_pad, d_pad), lambda l: (l, 0, 0)),
            # layer-l bias
            pl.BlockSpec((None, 1, d_pad), lambda l: (l, 0, 0)),
        ],
        out_specs=pl.BlockSpec((batch, d_out), lambda l: (0, 0)),
        scratch_shapes=[pltpu.VMEM((batch, d_pad), jnp.float32)],
        compiler_params=pltpu.CompilerParams(
            dimension_semantics=("arbitrary",),   # layer axis is sequential
        ),
        cost_estimate=pl.CostEstimate(
            flops=flops, transcendentals=0, bytes_accessed=bytes_accessed),
    )(x_pad, w_stack, b_stack)


# Pure-JAX reference using the SAME bf16-quantized weights (so the comparison
# isolates kernel correctness from the deliberate bf16 weight storage).
def mlp_base_forward_ref(packed, x):
    w_stack, b_stack, dims = packed["w"], packed["b"], packed["dims"]
    batch = x.shape[0]
    h = x.reshape(batch, -1).astype(jnp.float32)
    cur = dims[0]
    for l in range(w_stack.shape[0]):
        nxt = dims[l + 1]
        w = w_stack[l, :cur, :nxt]
        b = b_stack[l, 0, :nxt]
        y = jnp.dot(h.astype(jnp.bfloat16), w,
                    preferred_element_type=jnp.float32) + b
        h = jnp.maximum(y, 0.0)
        cur = nxt
    return h


if __name__ == "__main__":
    key = jax.random.PRNGKey(0)
    key, xk = jax.random.split(key)

    batch = 8
    input_shape = (4, 4)        # np.prod(input_shape) = 16
    hidden_shapes = [32, 32]    # two Linear layers, ReLU after each (incl. last)

    d_in = int(np.prod(input_shape))
    x = jax.random.normal(xk, (batch,) + input_shape, dtype=jnp.float32)

    params = init_mlp_params(key, d_in, hidden_shapes)
    packed = pack_mlp_params(params, d_in)

    out = jax.block_until_ready(mlp_base_forward(packed, x))
    ref = jax.block_until_ready(mlp_base_forward_ref(packed, x))

    assert out.shape == (batch, hidden_shapes[-1])
    assert jnp.allclose(out, ref, atol=1e-3, rtol=1e-3), (
        "mismatch vs reference; max abs diff = %g"
        % float(jnp.max(jnp.abs(out - ref))))

    print("KERNEL_OK")
</pallas_src>

<mosaic_0001>
module attributes {stable_mosaic.version = 11 : i64} {
  func.func @_fused_mlp_kernel(%arg0: i32, %arg1: memref<8x128xf32, #tpu.memory_space<vmem>>, %arg2: memref<1x128x128xbf16, #tpu.memory_space<vmem>>, %arg3: memref<1x1x128xf32, #tpu.memory_space<vmem>>, %arg4: memref<8x32xf32, #tpu.memory_space<vmem>>, %arg5: memref<8x128xf32, #tpu.memory_space<vmem>>) attributes {dimension_semantics = [#tpu.dimension_semantics<arbitrary>], iteration_bounds = array<i64: 2>, scalar_prefetch = 0 : i64, scratch_operands = 1 : i64, tpu.core_type = #tpu.core_type<tc>, window_params = [{pipeline_mode = #tpu.pipeline_mode<synchronous>, transform_indices = @transform_0, window_bounds = array<i64: 8, 128>}, {transform_indices = @transform_1, window_bounds = array<i64: 1, 128, 128>}, {transform_indices = @transform_2, window_bounds = array<i64: 1, 1, 128>}, {pipeline_mode = #tpu.pipeline_mode<synchronous>, transform_indices = @transform_3, window_bounds = array<i64: 8, 32>}]} {
    %c0_i32 = arith.constant 0 : i32
    %0 = arith.cmpi eq, %arg0, %c0_i32 : i32
    %1 = arith.extui %0 : i1 to i32
    %c0_i32_0 = arith.constant 0 : i32
    %2 = arith.cmpi ne, %1, %c0_i32_0 : i32
    scf.if %2 {
      %c0_12 = arith.constant 0 : index
      %c0_13 = arith.constant 0 : index
      %18 = vector.load %arg1[%c0_12, %c0_13] : memref<8x128xf32, #tpu.memory_space<vmem>>, vector<8x128xf32>
      %c0_14 = arith.constant 0 : index
      %c0_15 = arith.constant 0 : index
      %19 = vector.load %arg5[%c0_14, %c0_15] : memref<8x128xf32, #tpu.memory_space<vmem>>, vector<8x128xf32>
      tpu.vector_store %arg5[%c0_14, %c0_15], %18 {strides = array<i32>} : memref<8x128xf32, #tpu.memory_space<vmem>>, vector<8x128xf32>,
    } else {
    }
    %c0 = arith.constant 0 : index
    %c0_1 = arith.constant 0 : index
    %3 = vector.load %arg5[%c0, %c0_1] : memref<8x128xf32, #tpu.memory_space<vmem>>, vector<8x128xf32>
    %4 = arith.truncf %3 : vector<8x128xf32> to vector<8x128xbf16>
    %c0_2 = arith.constant 0 : index
    %c0_3 = arith.constant 0 : index
    %c0_4 = arith.constant 0 : index
    %5 = vector.load %arg2[%c0_2, %c0_3, %c0_4] : memref<1x128x128xbf16, #tpu.memory_space<vmem>>, vector<1x128x128xbf16>
    %6 = vector.shape_cast %5 : vector<1x128x128xbf16> to vector<128x128xbf16>
    %cst = arith.constant dense<0.000000e+00> : vector<8x128xf32>
    %7 = tpu.matmul %4, %6, %cst {dimension_numbers = #tpu.dot_dimension_numbers<[1], [0], [0], [1], [0, 0, 1, 1], [], []>} : vector<8x128xbf16>, vector<128x128xbf16>, vector<8x128xf32> -> vector<8x128xf32>
    %c0_5 = arith.constant 0 : index
    %c0_6 = arith.constant 0 : index
    %c0_7 = arith.constant 0 : index
    %8 = vector.load %arg3[%c0_5, %c0_6, %c0_7] : memref<1x1x128xf32, #tpu.memory_space<vmem>>, vector<1x1x128xf32>
    %9 = vector.shape_cast %8 : vector<1x1x128xf32> to vector<1x128xf32>
    %10 = vector.broadcast %9 : vector<1x128xf32> to vector<8x128xf32>
    %11 = arith.addf %7, %10 : vector<8x128xf32>
    %cst_8 = arith.constant 0.000000e+00 : f32
    %12 = vector.broadcast %cst_8 : f32 to vector<8x128xf32>
    %13 = arith.maximumf %11, %12 : vector<8x128xf32>
    %c0_9 = arith.constant 0 : index
    %c0_10 = arith.constant 0 : index
    %14 = vector.load %arg5[%c0_9, %c0_10] : memref<8x128xf32, #tpu.memory_space<vmem>>, vector<8x128xf32>
    tpu.vector_store %arg5[%c0_9, %c0_10], %13 {strides = array<i32>} : memref<8x128xf32, #tpu.memory_space<vmem>>, vector<8x128xf32>,
    %c1_i32 = arith.constant 1 : i32
    %15 = arith.cmpi eq, %arg0, %c1_i32 : i32
    %16 = arith.extui %15 : i1 to i32
    %c0_i32_11 = arith.constant 0 : i32
    %17 = arith.cmpi ne, %16, %c0_i32_11 : i32
    scf.if %17 {
      %c0_12 = arith.constant 0 : index
      %c0_13 = arith.constant 0 : index
      %18 = vector.load %arg5[%c0_12, %c0_13] : memref<8x128xf32, #tpu.memory_space<vmem>>, vector<8x32xf32>
      %c0_14 = arith.constant 0 : index
      %c0_15 = arith.constant 0 : index
      %19 = vector.load %arg4[%c0_14, %c0_15] : memref<8x32xf32, #tpu.memory_space<vmem>>, vector<8x32xf32>
      tpu.vector_store %arg4[%c0_14, %c0_15], %18 {strides = array<i32>} : memref<8x32xf32, #tpu.memory_space<vmem>>, vector<8x32xf32>,
    } else {
    }
    return
  }
  func.func @transform_0(%arg0: i32) -> (i32, i32) {
    %c0_i32 = arith.constant 0 : i32
    %c0_i32_0 = arith.constant 0 : i32
    %c0_i32_1 = arith.constant 0 : i32
    return %c0_i32, %c0_i32_0 : i32, i32
  }
  func.func @transform_1(%arg0: i32) -> (i32, i32, i32) {
    %c0_i32 = arith.constant 0 : i32
    %c0_i32_0 = arith.constant 0 : i32
    %c0_i32_1 = arith.constant 0 : i32
    return %arg0, %c0_i32, %c0_i32_0 : i32, i32, i32
  }
  func.func @transform_2(%arg0: i32) -> (i32, i32, i32) {
    %c0_i32 = arith.constant 0 : i32
    %c0_i32_0 = arith.constant 0 : i32
    %c0_i32_1 = arith.constant 0 : i32
    return %arg0, %c0_i32, %c0_i32_0 : i32, i32, i32
  }
  func.func @transform_3(%arg0: i32) -> (i32, i32) {
    %c0_i32 = arith.constant 0 : i32
    %c0_i32_0 = arith.constant 0 : i32
    %c0_i32_1 = arith.constant 0 : i32
    return %c0_i32, %c0_i32_0 : i32, i32
  }
}

</mosaic_0001>

<bundles_post_ra>
// kernel: tpu_custom_call.1
= control target key start
LH: loop header
LB: loop body
LE: loop exit
PB: predicated region body
PF: predicated region fallthrough
CT: control target
= control target key end

     0   :  { %8 = vsyncpa [#allocation4], 0  ;;  %s883_s0 = inlined_call_operand.hbm [shape: f32[8,128], index: 0, kind: input, shape index: {}]   ;;  %s884_s1 = inlined_call_operand.hbm [shape: bf16[2,128,128], index: 1, kind: input, shape index: {}]   ;;  %s885_s2 = inlined_call_operand.vmem [shape: f32[2,1,128], index: 2, kind: input, shape index: {}]   ;;  %s886_s3 = inlined_call_operand.hbm [shape: f32[8,32], index: 3, kind: output, shape index: {}]  }
   0x1   :  { %9 = vsyncpa [#allocation7], 0 }
   0x2   :  { %11 = vsyncpa [#allocation7 + $0x1], 0 }
   0x3   :  { %12 = vsyncpa [#allocation5], 0  ;;  %s690_s12 = smov 0   ;;  %s692_s13 = smov 0  }
   0x4   :  { %s694_s14 = smov 0   ;;  %s696_s15 = smov 0  }
   0x5 LB: > { %s709_s16 = sadd.s32 4294967295, %s661_s15   ;;  %s712_s17 = sadd.s32 1, %s661_s15   ;;  %s661_s15 = sphi %s696_s15, %s905_s15   ;;  %s657_s14 = sphi %s694_s14, %s904_s14   ;;  %s653_s13 = sphi %s692_s13, %s903_s13   ;;  %s649_s12 = sphi %s690_s12, %s902_s12  }
   0x6   : > { %s43_s18 = ssub.s32 %s661_s15, %s712_s17  ;;  %s46_s19 = sadd.s32 1, %s657_s14 }
   0x7   : > { %p44_p0 = scmp.eq.s32.totalorder %s43_s18, 0  ;;  %p53_p1 = scmp.ne.s32.totalorder %s657_s14, %s653_s13 }
   0x8   : > { %p54_p2 = scmp.eq.s32.totalorder %s661_s15, 0  ;;  %p59_p3 = scmp.ne.s32.totalorder %s653_s13, %s649_s12 }
   0x9   : > { %s722_s20 = scalar_select %p44_p0, %s657_s14, %s46_s19  }
   0xa   : > { %p724_p4 = por %p54_p2, %p53_p1  ;;  %p887_p5 = scmp.eq.s32.totalorder %s709_s16, 0 }
   0xb   : > { %p412_p6 = scmp.ge.s32.totalorder %s661_s15, 1  ;;  %p117_p7 = scmp.lt.s32.totalorder %s661_s15, 3 }
   0xc   : > { %p733_p8 = por %p887_p5, %p59_p3  ;;  %s663_s24 = smov [#allocation3]  }
   0xd   : > { %p738_p10 = pnand %p412_p6, %p117_p7  ;;  %s130_s25 = sshll.u32 %s663_s24, 4  ;;  %s131_s25 = int_to_ptr.vmem [resolvable:$true] %s130_s25 }
   0xe   : > { %s892_s22 = scalar_select %p733_p8, 1, 0 }
   0xf   : > { %s893_s23 = scalar_select %p738_p10, 1, 0 }
  0x10   : > { %p476_p11 = pneg %p738_p10  ;;  %p485_p12 = scmp.lt.s32.totalorder %s661_s15, 2 }
  0x11   : > { %s141_s26 = sand.u32 1, %s657_s14   ;;  %s535_s5 = scalar_lea.hbm %s883_s0, 128 }
  0x12   : > { %p748_p13 = pnand %p476_p11, %p887_p5  ;;  %p754_p0 = pnand %p485_p12, %p724_p4 }
  0x13   : > { %s415_s29 = sshll.u32 %s141_s26, 6  ;;  %p536_p1 = scmp.ne.s32.totalorder %s883_s0, %s535_s5 }
  0x14   : > { %s895_s28 = scalar_select %p754_p0, 1, 0 }
  0x15   : > { %p537_p2 = pneg %p748_p13  ;;  %p542_p4 = scmp.lt.u32.totalorder %s535_s5, %s883_s0 }
  0x17   : > { %p538_p3 = pnand %p537_p2, %p536_p1 }
  0x19   : > { %p539_p6 = pneg %p538_p3 }
  0x1b   : > { %p544_p7 = pnand %p542_p4, %p539_p6 }
  0x1d   : > { %547 = shalt.err (!%p544_p7)
}
  0x1e   : > { %s548_s10 = scalar_lea.vmem %s131_s25, 128  ;;  %p556_p5 = scmp.lt.s32.totalorder %s131_s25, %s131_s25 }
  0x1f   : > { %p549_p11 = scmp.ne.s32.totalorder %s131_s25, %s548_s10  ;;  %p557_p8 = scmp.lt.s32.totalorder %s548_s10, %s548_s10 }
  0x21   : > { %p551_p12 = pnand %p549_p11, %p537_p2  ;;  %p558_p10 = por %p557_p8, %p556_p5 }
  0x23   : > { %p552_p9 = pneg %p551_p12 }
  0x25   : > { %p559_p0 = pnand %p558_p10, %p552_p9 }
  0x27   : > { %562 = shalt.err (!%p559_p0)
}
  0x28   : > { %479 = dma.hbm_to_vmem [thread:$0]  (!%p748_p13), %s883_s0, 128, %s131_s25, [#allocation4]  }
  0x29   : > { %s436_s18 = sshll.u32 %s661_s15, 10  ;;  %s145_s30 = scalar_lea.vmem [#allocation6], %s415_s29 }
  0x2a   : > { %s778_s24 = scalar_lea.hbm %s884_s1, %s436_s18  ;;  %s152_s4 = sshll.u32 %s145_s30, 4  ;;  %s780_s4 = int_to_ptr.vmem [resolvable:$true] %s152_s4 }
  0x2b   : > { %s782_s27 = scalar_lea.sflag [#allocation7], %s141_s26  ;;  %s563_s5 = scalar_lea.hbm %s778_s24, 1024 }
  0x2c   : > { %p564_p5 = scmp.ne.s32.totalorder %s778_s24, %s563_s5  ;;  %p896_p8 = scmp.ne.s32.totalorder %s895_s28, 0 }
  0x2d   : > { %s568_s6 = scalar_lea.hbm %s884_s1, 2048  ;;  %p569_p0 = scmp.lt.u32.totalorder %s778_s24, %s884_s1 }
  0x2e   : > { %p565_p9 = pneg %p896_p8  ;;  %p570_p1 = scmp.lt.u32.totalorder %s568_s6, %s563_s5 }
  0x2f   : > { %p572_p3 = scmp.lt.u32.totalorder %s563_s5, %s778_s24 }
  0x30   : > { %p566_p10 = pnand %p565_p9, %p564_p5  ;;  %p571_p2 = por %p570_p1, %p569_p0 }
  0x32   : > { %p567_p13 = pneg %p566_p10  ;;  %p573_p6 = por %p572_p3, %p571_p2 }
  0x34   : > { %p574_p4 = pnand %p573_p6, %p567_p13 }
  0x36   : > { %577 = shalt.err (!%p574_p4)
}
  0x37   : > { %s578_s26 = scalar_lea.vmem %s780_s4, 1024  ;;  %s664_s29 = smov [#allocation6]  }
  0x38   : > { %p579_p7 = scmp.ne.s32.totalorder %s780_s4, %s578_s26  ;;  %s583_s9 = sshll.u32 %s664_s29, 4  ;;  %s584_s9 = int_to_ptr.vmem [resolvable:$false] %s583_s9 }
  0x39   : > { %s585_s10 = scalar_lea.vmem %s584_s9, 2048  ;;  %p586_p5 = scmp.lt.s32.totalorder %s780_s4, %s584_s9 }
  0x3a   : > { %p581_p11 = pnand %p579_p7, %p565_p9  ;;  %p587_p10 = scmp.lt.s32.totalorder %s585_s10, %s578_s26 }
  0x3c   : > { %p582_p12 = pneg %p581_p11  ;;  %p588_p0 = por %p587_p10, %p586_p5 }
  0x3e   : > { %p589_p1 = pnand %p588_p0, %p582_p12 }
  0x40   : > { %592 = shalt.err (!%p589_p1)
}
  0x41   : > { %s665_s11 = smov 64   ;;  %s666_s12 = smov 4  }
  0x42   : > { %483 = dma.hbm_to_vmem [thread:$0]  (!%p896_p8), %s778_s24, 1024, %s780_s4, %s782_s27, %s665_s11, %s665_s11, %s666_s12  }
  0x43   : > { %p897_p9 = scmp.ne.s32.totalorder %s893_s23, 0 }
  0x44   : > { %p898_p13 = scmp.eq.s32.totalorder (!%p897_p9), %s709_s16, 0 }
  0x45   : > { %170 = sbr.rel (%p897_p9) target bundleno = 374 (0x176), region = 32 }
  0x4c   : > { %636 = dma.done.wait (%p898_p13), [#allocation4], 128   ;;  %p899_p2 = pmov %p898_p13 }
  0x4d   : > { %s176_s18 = sand.u32 1, %s653_s13   ;;  %p900_p3 = scmp.ne.s32.totalorder %s892_s22, 0 }
  0x4e   : > { %638 = vsyncadd (%p899_p2), [#allocation4], 4294967168  ;;  %s420_s19 = sshll.u32 %s176_s18, 6  ;;  %s177_s21 = scalar_lea.sflag [#allocation7], %s176_s18 }
  0x4f   : > { %s817_s30 = scalar_lea.vmem [#allocation6], %s420_s19 }
  0x50   : > { %640 = dma.done.wait (%p900_p3), %s177_s21, 1024  }
  0x51   : > { %642 = vsyncadd (%p900_p3), %s177_s21, 4294966272  ;;  %p201_p8 = scmp.lt.s32.totalorder %s709_s16, 1  ;;  %p901_p6 = scmp.ne.s32.totalorder %s709_s16, 0 }
  0x52   : > { %v209_v0 = vld [vmem:[#allocation3] sm:$0xff] (!%p901_p6) }
  0x53   : > { %s825_s23 = scalar_select %p201_p8, %s709_s16, 1 }
  0x54   : > { %208 = sbr.rel (%p901_p6) target bundleno = 91 (0x5b), region = 44  ;;  %210 = vst [vmem:[#allocation2] sm:$0xff] (!%p901_p6), %v209_v0 }
  0x55   : > { %s203_s4 = scalar_lea.vmem %s885_s2, %s825_s23 }
  0x5b PF: > { %v527_v1 = vld [vmem:[%s817_s30] sm:$0xff]   ;;  %v667_v2 = vmov 0.0   ;;  %v528_v3 = vld [vmem:[%s817_s30 + $0x8] sm:$0xff]   ;;  %vm668_vm0 = vmmov 0   ;;  %v529_v4 = vld [vmem:[%s817_s30 + $0x10] sm:$0xff]   ;;  %p431_p4 = scmp.ne.s32.totalorder %s709_s16, 1 }
  0x5c   : > { %446 = vmatprep.subr.bf16.mxu0 %v667_v2  ;;  %462 = vmatprep.mubr.msk.bf16.mxu0 %vm668_vm0, %v667_v2  ;;  %v530_v5 = vld [vmem:[%s817_s30 + $0x18] sm:$0xff]   ;;  %v531_v6 = vld [vmem:[%s817_s30 + $0x20] sm:$0xff]   ;;  %v532_v7 = vld [vmem:[%s817_s30 + $0x28] sm:$0xff]   ;;  %vm331_vm1 = vcmask (!%p431_p4), 261120  }
  0x5d   : > { %447 = vmatpush3.bf16.msra.mxu0 %v527_v1  ;;  %v533_v8 = vld [vmem:[%s817_s30 + $0x30] sm:$0xff]   ;;  %v534_v9 = vld [vmem:[%s817_s30 + $0x38] sm:$0xff]  }
  0x5e   : > { %448 = vmatprep.subr.bf16.mxu0 %v667_v2  ;;  %v211_v10 = vld [vmem:[#allocation2] sm:$0xff] }
  0x5f   : > { %v212_v11 = vpack.c.bf16 %v211_v10, %v211_v10  ;;  %v422_v12 = vld [vmem:[%s203_s4] ss:$0 sm:$0xff] }
  0x61   : > { %449 = vmatpush3.bf16.msra.mxu0 %v528_v3 }
  0x62   : > { %450 = vmatprep.subr.bf16.mxu0 %v667_v2 }
  0x65   : > { %451 = vmatpush3.bf16.msra.mxu0 %v529_v4 }
  0x66   : > { %452 = vmatprep.subr.bf16.mxu0 %v667_v2 }
  0x69   : > { %453 = vmatpush3.bf16.msra.mxu0 %v530_v5 }
  0x6a   : > { %454 = vmatprep.subr.bf16.mxu0 %v667_v2 }
  0x6d   : > { %455 = vmatpush3.bf16.msra.mxu0 %v531_v6 }
  0x6e   : > { %456 = vmatprep.subr.bf16.mxu0 %v667_v2 }
  0x71   : > { %457 = vmatpush3.bf16.msra.mxu0 %v532_v7 }
  0x72   : > { %458 = vmatprep.subr.bf16.mxu0 %v667_v2 }
  0x75   : > { %459 = vmatpush3.bf16.msra.mxu0 %v533_v8 }
  0x76   : > { %460 = vmatprep.subr.bf16.mxu0 %v667_v2 }
  0x79   : > { %461 = vmatpush3.bf16.msra.mxu0 %v534_v9 }
  0x7c   : > { %463 = vmatmul.mubr.bf16.vlgmr.msra.gmra.mrb[0].mxu0 %v212_v11 }
 0x14e   : > { %329 = sbr.rel (%p431_p4) target bundleno = 349 (0x15d), region = 48 }
 0x14f   : > { %v318_v13 = vpop.f32.mrb[0].mxu0 }
 0x150   : > { %v319_v14 = vadd.f32 %v422_v12, %v318_v13  ;;  %v464_v15 = vpop.f32.mrb[1].mxu0 }
 0x151   : > { %v321_v16 = vpop.f32.mrb[2].mxu0 }
 0x152   : > { %v324_v17 = vmax.f32 %v319_v14, 0.0  ;;  %v465_v18 = vpop.f32.mrb[3].mxu0 }
 0x154   : > { %325 = vst [vmem:[#allocation2] sm:$0xff] %v324_v17 }
 0x15b   : > { %v330_v19 = vld [vmem:[#allocation2] sm:$0xff] }
 0x15c   : > { %332 = vst.msk [vmem:[#allocation8] sm:$0xff] %vm331_vm1, %v330_v19 }
 0x15d PF: > { %p487_p7 = scmp.eq.s32.totalorder %s709_s16, 1  ;;  %s669_s5 = smov [#allocation8]  }
 0x15e   : > { %s340_s15 = sshll.u32 %s669_s5, 4  ;;  %s341_s15 = int_to_ptr.vmem [resolvable:$true] %s340_s15 }
 0x15f   : > { %s593_s25 = scalar_lea.vmem %s341_s15, 128  ;;  %p600_p10 = scmp.lt.s32.totalorder %s341_s15, %s341_s15 }
 0x160   : > { %p594_p11 = scmp.ne.s32.totalorder %s341_s15, %s593_s25  ;;  %p601_p0 = scmp.lt.s32.totalorder %s593_s25, %s593_s25 }
 0x162   : > { %p595_p12 = pnand %p594_p11, %p487_p7  ;;  %p602_p1 = por %p601_p0, %p600_p10 }
 0x164   : > { %p596_p5 = pneg %p595_p12 }
 0x166   : > { %p603_p9 = pnand %p602_p1, %p596_p5 }
 0x168   : > { %606 = shalt.err (!%p603_p9)
}
 0x169   : > { %s607_s8 = scalar_lea.hbm %s886_s3, 128 }
 0x16a   : > { %p608_p13 = scmp.ne.s32.totalorder %s886_s3, %s607_s8  ;;  %p613_p8 = scmp.lt.u32.totalorder %s607_s8, %s886_s3 }
 0x16c   : > { %p609_p2 = pnand %p608_p13, %p487_p7 }
 0x16e   : > { %p610_p3 = pneg %p609_p2 }
 0x170   : > { %p615_p6 = pnand %p613_p8, %p610_p3 }
 0x172   : > { %618 = shalt.err (!%p615_p6)
}
 0x173   : > { %473 = dma.vmem_to_hbm [thread:$0]  (%p487_p7), %s341_s15, 128, %s886_s3, [#allocation5]  }
 0x174   : > { %644 = dma.done.wait (%p487_p7), [#allocation5], 128  }
 0x175   : > { %646 = vsyncadd (%p487_p7), [#allocation5], 4294967168 }
 0x176 PF: > { %p15_p4 = scmp.ge.s32.totalorder %s712_s17, 4   ;;  %s902_s12 = smov %s653_s13 }
 0x177   : > { %s903_s13 = smov %s657_s14  ;;  %s904_s14 = smov %s722_s20 }
 0x178   : > { %s905_s15 = smov %s712_s17  ;;  %17 = sbr.rel (!%p15_p4) target bundleno = 5 (0x5), region = 85 }
 0x17f   :  { %353 = vsyncpa [#allocation4], 1 }
 0x180   :  { %355 = vsyncpa [#allocation4 + $0x1], 1 }
 0x181   :  { %356 = vsyncpa [#allocation7], 1 }
 0x182   :  { %358 = vsyncpa [#allocation7 + $0x1], 1 }
 0x183   :  { %359 = vsyncpa [#allocation5], 1 }
 0x184   :  { %361 = vsyncpa [#allocation5 + $0x1], 1 }

</bundles_post_ra>
